<compile_context>
chip_gen: v7x
topology: tpu7x:2x2x1
jax: 0.10.0
libtpu: 0.0.40
codegen_flags: <defaults>
</compile_context>

<pallas_src>
import functools

import jax
import jax.numpy as jnp
from jax import lax
from jax.experimental import pallas as pl
from jax.experimental.pallas import tpu as pltpu


def _gem_kernel(x_ref, o_ref, *, p, p_int, eps, inv_hw, inv_p, lane_chunks):
    """x_ref: (tile_rows, H*W) tile, o_ref: (tile_rows, 1)."""

    def powed(x):
        x = jnp.maximum(x.astype(jnp.float32), eps)       # clamp(min=eps) > 0
        if p_int is not None:
            # Static integer exponent (default p=3): pure VALU multiplies,
            # bit-closer to the PyTorch x**p reference than exp/log.
            return lax.integer_pow(x, p_int)
        # Fallback for non-integer p (x >= eps > 0 so log is safe).
        return jnp.exp(p * jnp.log(x))

    if lane_chunks > 1:
        # Two-stage reduction: accumulate 128-lane chunks with VPU adds
        # (keeps vreg pressure low), then one cross-lane (XLU) sum.
        acc = powed(x_ref[:, 0:128])
        for c in range(1, lane_chunks):
            acc = acc + powed(x_ref[:, c * 128:(c + 1) * 128])
        s = jnp.sum(acc, axis=-1, keepdims=True)
    else:
        s = jnp.sum(powed(x_ref[...]), axis=-1, keepdims=True)

    m = s * inv_hw                                          # global mean, (tile_rows, 1)
    # Final root only on the reduced column; m >= eps^p > 0 so exp/log is safe.
    y = jnp.exp(jnp.log(m) * inv_p)                         # m ** (1/p)
    o_ref[...] = y.astype(o_ref.dtype)


def _choose_tile_rows(rows, hw, itemsize):
    """Pick a row-tile so the double-buffered input stays well under the
    smallest scoped-VMEM default (v5e: 16 MiB), while each tile is big enough
    (~2 MiB) to amortize per-grid-step overhead on v6e/v7x."""
    lane_hw = ((hw + 127) // 128) * 128       # lane padding to 128
    target_bytes = 2 * 1024 * 1024            # ~2 MiB/tile -> ~4 MiB double-buffered input
    tr = max(16, target_bytes // (lane_hw * itemsize))
    tr = min(tr, 4096)
    tr = max(16, (tr // 16) * 16)             # multiple of 16 (bf16 sublane packing, f32 too)
    if rows <= tr:
        return rows                           # full-dim block: (8,128) rule satisfied
    return tr


def adaptive_gem2d_pallas(x, output_size=(1, 1), p=3.0, eps=1e-6):
    assert tuple(output_size) == (1, 1), "kernel implements global GeM (output_size=(1,1))"
    N, C, H, W = x.shape
    rows = N * C
    hw = H * W
    # Keep native dtype in HBM (e.g. bf16 inputs are read as bf16; cast to f32 in-kernel).
    x2 = x.reshape(rows, hw)

    p = float(p)
    p_int = int(p) if (p == int(p) and 1 <= int(p) <= 16) else None
    lane_chunks = hw // 128 if (hw % 128 == 0 and hw > 128) else 1
    # NOTE: for small hw not a multiple of 128 (e.g. 7x7=49) lanes are padded to 128;
    # dense lane re-packing is a further optimization not implemented here.

    tile_rows = _choose_tile_rows(rows, hw, x.dtype.itemsize)
    grid = (pl.cdiv(rows, tile_rows),)

    kernel = functools.partial(
        _gem_kernel,
        p=p,
        p_int=p_int,
        eps=float(eps),
        inv_hw=1.0 / hw,
        inv_p=1.0 / p,
        lane_chunks=lane_chunks,
    )

    # Advisory cost estimate: this kernel is HBM-read-bound.
    if p_int is not None:
        flops = rows * hw * (p_int + 1) + 4 * rows
        transcendentals = 2 * rows
    else:
        flops = rows * hw * 3 + 4 * rows
        transcendentals = 2 * rows * hw + 2 * rows
    cost = pl.CostEstimate(
        flops=int(flops),
        transcendentals=int(transcendentals),
        bytes_accessed=int(rows * hw * x.dtype.itemsize + rows * x.dtype.itemsize),
    )

    out = pl.pallas_call(
        kernel,
        out_shape=jax.ShapeDtypeStruct((rows, 1), x.dtype),
        grid=grid,
        in_specs=[pl.BlockSpec((tile_rows, hw), lambda i: (i, 0))],
        out_specs=pl.BlockSpec((tile_rows, 1), lambda i: (i, 0)),
        compiler_params=pltpu.CompilerParams(
            dimension_semantics=("parallel",),
        ),
        cost_estimate=cost,
    )(x2)

    return out.reshape(N, C, 1, 1)


def adaptive_gem2d_ref(x, p=3.0, eps=1e-6):
    # Pure-JAX reference for verification.
    xc = jnp.maximum(x.astype(jnp.float32), eps)
    return (jnp.mean(xc ** p, axis=(2, 3), keepdims=True) ** (1.0 / p)).astype(x.dtype)


if __name__ == "__main__":
    # Module defaults: output_size=(1,1), p=3.0, eps=1e-6, freeze_p=True
    # (p is a plain float; no learnable parameters).
    key = jax.random.PRNGKey(0)

    # Main check: small NCHW input, f32.
    N, C, H, W = 2, 4, 16, 16
    x = jax.random.normal(key, (N, C, H, W), dtype=jnp.float32)
    y = jax.block_until_ready(adaptive_gem2d_pallas(x, (1, 1), p=3.0, eps=1e-6))
    y_ref = adaptive_gem2d_ref(x, p=3.0, eps=1e-6)
    assert y.shape == (N, C, 1, 1), y.shape
    assert jnp.allclose(y, y_ref, rtol=1e-5, atol=1e-5), float(jnp.max(jnp.abs(y - y_ref)))

    # Secondary check: H*W not a multiple of 128 (typical 7x7 feature map), odd row count.
    x2 = jax.random.normal(jax.random.PRNGKey(1), (3, 5, 7, 7), dtype=jnp.float32)
    y2 = jax.block_until_ready(adaptive_gem2d_pallas(x2, (1, 1), p=3.0, eps=1e-6))
    y2_ref = adaptive_gem2d_ref(x2, p=3.0, eps=1e-6)
    assert jnp.allclose(y2, y2_ref, rtol=1e-5, atol=1e-5), float(jnp.max(jnp.abs(y2 - y2_ref)))

    print("KERNEL_OK")
</pallas_src>

<mosaic_0001>
module attributes {stable_mosaic.version = 11 : i64} {
  func.func @_gem_kernel(%arg0: i32, %arg1: memref<8x256xf32, #tpu.memory_space<vmem>>, %arg2: memref<8x1xf32, #tpu.memory_space<vmem>>) attributes {dimension_semantics = [#tpu.dimension_semantics<parallel>], iteration_bounds = array<i64: 1>, scalar_prefetch = 0 : i64, scratch_operands = 0 : i64, tpu.core_type = #tpu.core_type<tc>, window_params = [{transform_indices = @transform_0, window_bounds = array<i64: 8, 256>}, {transform_indices = @transform_1, window_bounds = array<i64: 8, 1>}]} {
    %c0 = arith.constant 0 : index
    %c0_0 = arith.constant 0 : index
    %0 = vector.load %arg1[%c0, %c0_0] : memref<8x256xf32, #tpu.memory_space<vmem>>, vector<8x128xf32>
    %cst = arith.constant 9.99999997E-7 : f32
    %1 = vector.broadcast %cst : f32 to vector<8x128xf32>
    %2 = arith.maximumf %0, %1 : vector<8x128xf32>
    %3 = arith.mulf %2, %2 : vector<8x128xf32>
    %4 = arith.mulf %2, %3 : vector<8x128xf32>
    %c0_1 = arith.constant 0 : index
    %c128 = arith.constant 128 : index
    %5 = vector.load %arg1[%c0_1, %c128] : memref<8x256xf32, #tpu.memory_space<vmem>>, vector<8x128xf32>
    %cst_2 = arith.constant 9.99999997E-7 : f32
    %6 = vector.broadcast %cst_2 : f32 to vector<8x128xf32>
    %7 = arith.maximumf %5, %6 : vector<8x128xf32>
    %8 = arith.mulf %7, %7 : vector<8x128xf32>
    %9 = arith.mulf %7, %8 : vector<8x128xf32>
    %10 = arith.addf %4, %9 : vector<8x128xf32>
    %cst_3 = arith.constant dense<0.000000e+00> : vector<8xf32>
    %11 = vector.multi_reduction <add>, %10, %cst_3 [1] : vector<8x128xf32> to vector<8xf32>
    %12 = vector.shape_cast %11 : vector<8xf32> to vector<8x1xf32>
    %cst_4 = arith.constant 3.906250e-03 : f32
    %13 = vector.broadcast %cst_4 : f32 to vector<8x1xf32>
    %14 = arith.mulf %12, %13 : vector<8x1xf32>
    %15 = math.log %14 : vector<8x1xf32>
    %cst_5 = arith.constant 0.333333343 : f32
    %16 = vector.broadcast %cst_5 : f32 to vector<8x1xf32>
    %17 = arith.mulf %15, %16 : vector<8x1xf32>
    %18 = math.exp %17 : vector<8x1xf32>
    %c0_6 = arith.constant 0 : index
    %c0_7 = arith.constant 0 : index
    %19 = vector.load %arg2[%c0_6, %c0_7] : memref<8x1xf32, #tpu.memory_space<vmem>>, vector<8x1xf32>
    tpu.vector_store %arg2[%c0_6, %c0_7], %18 {strides = array<i32>} : memref<8x1xf32, #tpu.memory_space<vmem>>, vector<8x1xf32>,
    return
  }
  func.func @transform_0(%arg0: i32) -> (i32, i32) {
    %c0_i32 = arith.constant 0 : i32
    %c0_i32_0 = arith.constant 0 : i32
    return %arg0, %c0_i32 : i32, i32
  }
  func.func @transform_1(%arg0: i32) -> (i32, i32) {
    %c0_i32 = arith.constant 0 : i32
    %c0_i32_0 = arith.constant 0 : i32
    return %arg0, %c0_i32 : i32, i32
  }
}

</mosaic_0001>

<bundles_post_ra>
// kernel: tpu_custom_call.1
= control target key start
LH: loop header
LB: loop body
LE: loop exit
PB: predicated region body
PF: predicated region fallthrough
CT: control target
= control target key end

     0   :  { %6 = vsyncpa [#allocation3], 0  ;;  %s73_s6 = smov [#allocation2]   ;;  %s99_s0 = inlined_call_operand.hbm [shape: f32[8,256], index: 0, kind: input, shape index: {}]   ;;  %s100_s1 = inlined_call_operand.vmem [shape: f32[8,1], index: 1, kind: output, shape index: {}]  }
   0x1   :  { %s13_s7 = sshll.u32 %s73_s6, 4  ;;  %s49_s10 = scalar_lea.hbm %s99_s0, 256  ;;  %s14_s7 = int_to_ptr.vmem [resolvable:$true] %s13_s7 }
   0x2   :  { %p50_p0 = scmp.ne.s32.totalorder %s99_s0, %s49_s10  ;;  %p53_p1 = scmp.lt.u32.totalorder %s49_s10, %s99_s0 }
   0x4   :  { %p55_p2 = pnand %p53_p1, %p50_p0 }
   0x6   :  { %58 = shalt.err (!%p55_p2)
}
   0x7   :  { %s59_s15 = scalar_lea.vmem %s14_s7, 256  ;;  %p64_p4 = scmp.lt.s32.totalorder %s14_s7, %s14_s7 }
   0x8   :  { %p60_p3 = scmp.ne.s32.totalorder %s14_s7, %s59_s15  ;;  %p65_p5 = scmp.lt.s32.totalorder %s59_s15, %s59_s15 }
   0xa   :  { %p66_p6 = por %p65_p5, %p64_p4 }
   0xc   :  { %p67_p7 = pnand %p66_p6, %p60_p3 }
   0xe   :  { %70 = shalt.err (!%p67_p7)
}
   0xf   :  { %16 = dma.hbm_to_vmem [thread:$0]  %s99_s0, 256, %s14_s7, [#allocation3]  }
  0x10   :  { %71 = dma.done.wait [#allocation3], 256  }
  0x11   :  { %72 = vsyncadd [#allocation3], 4294967040  ;;  %v20_v0 = vld [vmem:[#allocation2] sm:$0xff]  ;;  %v24_v1 = vld [vmem:[#allocation2 + $0x8] sm:$0xff]  ;;  %vm37_vm0 = vcmask 7168  }
  0x12   :  { %v21_v2 = vmax.f32 %v20_v0, 1e-06  ;;  %v25_v3 = vmax.f32 %v24_v1, 1e-06 }
  0x14   :  { %v22_v4 = vmul.f32 %v21_v2, %v21_v2  ;;  %v26_v5 = vmul.f32 %v25_v3, %v25_v3 }
  0x16   :  { %v23_v6 = vmul.f32 %v22_v4, %v21_v2  ;;  %v27_v7 = vmul.f32 %v26_v5, %v25_v3 }
  0x18   :  { %v28_v8 = vadd.f32 %v27_v7, %v23_v6 }
  0x1a   :  { %29 = vadd.xlane.f32.xlu0 %v28_v8 }
  0xa7   :  { %v30_v9 = vpop.xlane.xlu0 %29 }
  0xa8   :  { %v31_v10 = vmul.f32 0.00390625, %v30_v9 }
  0xaa   :  { %45 = vlog2.f32 %v31_v10 }
  0xb4   :  { %v46_v11 = vpop.eup %45 }
  0xb5   :  { %v33_v12 = vmul.f32 0.6931472, %v46_v11 }
  0xb7   :  { %v34_v13 = vmul.f32 0.33333334, %v33_v12 }
  0xb9   :  { %v35_v14 = vmul.f32 1.442695, %v34_v13 }
  0xbb   :  { %47 = vpow2.f32 %v35_v14 }
  0xc5   :  { %v48_v15 = vpop.eup %47 }
  0xc6   :  { %38 = vst.msk [vmem:[%s100_s1] sm:$0xff] %vm37_vm0, %v48_v15 }
  0xc7   :  { %43 = vsyncpa [#allocation3], 1 }

</bundles_post_ra>
